<compile_context>
chip_gen: v7x
topology: tpu7x:2x2x1
jax: 0.10.0
libtpu: 0.0.40
codegen_flags: <defaults>
</compile_context>

<pallas_src>
import functools

import jax
import jax.numpy as jnp
from jax.experimental import pallas as pl
from jax.experimental.pallas import tpu as pltpu


# ---------------------------------------------------------------------------
# Pallas kernel
# ---------------------------------------------------------------------------
def _space_to_depth_kernel(x_ref, o_ref, *, bs, row_tile, wo):
    """x_ref: (row_tile*bs, W, C)  ->  o_ref: (row_tile, Wo, C*bs*bs).

    out[i, j, (bh*bs + bw)*C + c] = x[i*bs + bh, j*bs + bw, c]
    (matches PyTorch's permute(0, 3, 5, 1, 2, 4) channel ordering).
    """
    parts = []
    for bh in range(bs):
        for bw in range(bs):
            # Strides only on the outer (H) and sublane (W) dims; the lane
            # (channel) dim is read contiguously.
            parts.append(
                x_ref[pl.ds(bh, row_tile, stride=bs),
                      pl.ds(bw, wo, stride=bs), :])
    # Assemble the full output tile in registers and emit one lane-dense store.
    o_ref[...] = jnp.concatenate(parts, axis=-1)


def _pick_row_tile(ho, w, c, bs, itemsize, max_bytes=4 << 20):
    """Largest divisor of `ho` whose (8,128)-padded input slab fits the budget."""
    w_pad = -(-w // 8) * 8        # sublane padding of the (W, C) trailing dims
    c_pad = -(-c // 128) * 128    # lane padding
    for th in range(ho, 0, -1):
        if ho % th == 0 and th * bs * w_pad * c_pad * itemsize <= max_bytes:
            return th
    return 1


def space_to_depth(x_nchw, block_size):
    """TF-style space_to_depth on an NCHW tensor (PyTorch SpaceToDepth)."""
    bs = int(block_size)
    n, c, h, w = x_nchw.shape
    if h % bs or w % bs:
        raise ValueError(f"H={h}, W={w} must be divisible by block_size={bs}")
    ho, wo = h // bs, w // bs

    # Layout adaptation only (channels-last), so the in-kernel gather never
    # strides along the lane axis.
    x_nhwc = jnp.transpose(x_nchw, (0, 2, 3, 1))

    row_tile = _pick_row_tile(ho, w, c, bs, x_nchw.dtype.itemsize)
    grid = (n, ho // row_tile)

    kernel = functools.partial(
        _space_to_depth_kernel, bs=bs, row_tile=row_tile, wo=wo)

    out_nhwc = pl.pallas_call(
        kernel,
        out_shape=jax.ShapeDtypeStruct((n, ho, wo, c * bs * bs), x_nchw.dtype),
        grid_spec=pltpu.PrefetchScalarGridSpec(
            num_scalar_prefetch=0,
            grid=grid,
            in_specs=[
                pl.BlockSpec((None, row_tile * bs, w, c),
                             lambda ni, ti: (ni, ti, 0, 0)),
            ],
            out_specs=pl.BlockSpec((None, row_tile, wo, c * bs * bs),
                                   lambda ni, ti: (ni, ti, 0, 0)),
        ),
        compiler_params=pltpu.CompilerParams(
            dimension_semantics=("parallel", "parallel")),
    )(x_nhwc)

    # Back to the module's NCHW contract.
    return jnp.transpose(out_nhwc, (0, 3, 1, 2))


# ---------------------------------------------------------------------------
# Pure-JAX reference (mirrors the PyTorch forward exactly)
# ---------------------------------------------------------------------------
def _ref_space_to_depth(x, bs):
    n, c, h, w = x.shape
    y = x.reshape(n, c, h // bs, bs, w // bs, bs)
    y = jnp.transpose(y, (0, 3, 5, 1, 2, 4))
    return y.reshape(n, c * bs * bs, h // bs, w // bs)


if __name__ == "__main__":
    key = jax.random.PRNGKey(0)
    x = jax.random.normal(key, (2, 4, 16, 16), dtype=jnp.float32)

    s2d = jax.jit(space_to_depth, static_argnums=1)

    # block_size = 2
    out2 = jax.block_until_ready(s2d(x, 2))
    assert out2.shape == (2, 16, 8, 8), out2.shape
    ref2 = _ref_space_to_depth(x, 2)
    assert bool(jnp.array_equal(out2, ref2)), float(jnp.max(jnp.abs(out2 - ref2)))

    # block_size = 4 (exercise a second block size with the same kernel)
    out4 = jax.block_until_ready(s2d(x, 4))
    assert out4.shape == (2, 64, 4, 4), out4.shape
    ref4 = _ref_space_to_depth(x, 4)
    assert bool(jnp.array_equal(out4, ref4)), float(jnp.max(jnp.abs(out4 - ref4)))

    print("KERNEL_OK")
</pallas_src>

<mosaic_0001>
module attributes {stable_mosaic.version = 11 : i64} {
  func.func @_space_to_depth_kernel(%arg0: i32, %arg1: i32, %arg2: memref<1x16x16x4xf32, #tpu.memory_space<vmem>>, %arg3: memref<1x8x8x16xf32, #tpu.memory_space<vmem>>) attributes {dimension_semantics = [#tpu.dimension_semantics<parallel>, #tpu.dimension_semantics<parallel>], iteration_bounds = array<i64: 2, 1>, scalar_prefetch = 0 : i64, scratch_operands = 0 : i64, tpu.core_type = #tpu.core_type<tc>, window_params = [{transform_indices = @transform_0, window_bounds = array<i64: 1, 16, 16, 4>}, {transform_indices = @transform_1, window_bounds = array<i64: 1, 8, 8, 16>}]} {
    %c0 = arith.constant 0 : index
    %c0_0 = arith.constant 0 : index
    %c0_1 = arith.constant 0 : index
    %c0_2 = arith.constant 0 : index
    %0 = tpu.strided_load %arg2[%c0, %c0_0, %c0_1, %c0_2] {strides = array<i32: 1, 2, 2, 1>} : memref<1x16x16x4xf32, #tpu.memory_space<vmem>>, vector<1x8x8x4xf32>
    %1 = vector.shape_cast %0 : vector<1x8x8x4xf32> to vector<8x8x4xf32>
    %c0_3 = arith.constant 0 : index
    %c0_4 = arith.constant 0 : index
    %c1 = arith.constant 1 : index
    %c0_5 = arith.constant 0 : index
    %2 = tpu.strided_load %arg2[%c0_3, %c0_4, %c1, %c0_5] {strides = array<i32: 1, 2, 2, 1>} : memref<1x16x16x4xf32, #tpu.memory_space<vmem>>, vector<1x8x8x4xf32>
    %3 = vector.shape_cast %2 : vector<1x8x8x4xf32> to vector<8x8x4xf32>
    %c0_6 = arith.constant 0 : index
    %c1_7 = arith.constant 1 : index
    %c0_8 = arith.constant 0 : index
    %c0_9 = arith.constant 0 : index
    %4 = tpu.strided_load %arg2[%c0_6, %c1_7, %c0_8, %c0_9] {strides = array<i32: 1, 2, 2, 1>} : memref<1x16x16x4xf32, #tpu.memory_space<vmem>>, vector<1x8x8x4xf32>
    %5 = vector.shape_cast %4 : vector<1x8x8x4xf32> to vector<8x8x4xf32>
    %c0_10 = arith.constant 0 : index
    %c1_11 = arith.constant 1 : index
    %c1_12 = arith.constant 1 : index
    %c0_13 = arith.constant 0 : index
    %6 = tpu.strided_load %arg2[%c0_10, %c1_11, %c1_12, %c0_13] {strides = array<i32: 1, 2, 2, 1>} : memref<1x16x16x4xf32, #tpu.memory_space<vmem>>, vector<1x8x8x4xf32>
    %7 = vector.shape_cast %6 : vector<1x8x8x4xf32> to vector<8x8x4xf32>
    %8 = tpu.concatenate %1, %3, %5, %7 in 2 : vector<8x8x4xf32>, vector<8x8x4xf32>, vector<8x8x4xf32>, vector<8x8x4xf32> -> vector<8x8x16xf32>
    %c0_14 = arith.constant 0 : index
    %c0_15 = arith.constant 0 : index
    %c0_16 = arith.constant 0 : index
    %c0_17 = arith.constant 0 : index
    %9 = vector.load %arg3[%c0_14, %c0_15, %c0_16, %c0_17] : memref<1x8x8x16xf32, #tpu.memory_space<vmem>>, vector<1x8x8x16xf32>
    %10 = vector.shape_cast %9 : vector<1x8x8x16xf32> to vector<8x8x16xf32>
    %11 = vector.shape_cast %8 : vector<8x8x16xf32> to vector<1x8x8x16xf32>
    tpu.vector_store %arg3[%c0_14, %c0_15, %c0_16, %c0_17], %11 {strides = array<i32>} : memref<1x8x8x16xf32, #tpu.memory_space<vmem>>, vector<1x8x8x16xf32>,
    return
  }
  func.func @transform_0(%arg0: i32, %arg1: i32) -> (i32, i32, i32, i32) {
    %c0_i32 = arith.constant 0 : i32
    %c0_i32_0 = arith.constant 0 : i32
    %c0_i32_1 = arith.constant 0 : i32
    return %arg0, %arg1, %c0_i32, %c0_i32_0 : i32, i32, i32, i32
  }
  func.func @transform_1(%arg0: i32, %arg1: i32) -> (i32, i32, i32, i32) {
    %c0_i32 = arith.constant 0 : i32
    %c0_i32_0 = arith.constant 0 : i32
    %c0_i32_1 = arith.constant 0 : i32
    return %arg0, %arg1, %c0_i32, %c0_i32_0 : i32, i32, i32, i32
  }
}

</mosaic_0001>

<bundles_post_ra>
// kernel: space_to_depth.1
= control target key start
LH: loop header
LB: loop body
LE: loop exit
PB: predicated region body
PF: predicated region fallthrough
CT: control target
= control target key end

     0   :  { %6 = vsyncpa [#allocation3], 0  ;;  %s862_s0 = inlined_call_operand.vmem [shape: f32[2,16,16,4], index: 0, kind: input, shape index: {}]   ;;  %s863_s1 = inlined_call_operand.hbm [shape: f32[2,8,8,16], index: 1, kind: output, shape index: {}]  }
   0x1   :  { %8 = vsyncpa [#allocation3 + $0x1], 0  ;;  %s657_s6 = smov 0   ;;  %s659_s7 = smov 0  }
   0x2   :  { %s661_s8 = smov 0   ;;  %s663_s9 = smov 0  }
   0x3   :  { %s665_s10 = smov 0   ;;  %s667_s11 = smov 0  }
   0x4 LB: > { %s457_s12 = sadd.s32 4294967295, %s640_s11   ;;  %s458_s13 = sadd.s32 4294967294, %s640_s11   ;;  %s640_s11 = sphi %s667_s11, %s14_s11   ;;  %s636_s10 = sphi %s665_s10, %s870_s10   ;;  %s632_s9 = sphi %s663_s9, %s869_s9   ;;  %s628_s8 = sphi %s661_s8, %s868_s8   ;;  %s624_s7 = sphi %s659_s7, %s867_s7   ;;  %s620_s6 = sphi %s657_s6, %s866_s6  }
   0x5   : > { %s26_s14 = sadd.s32 1, %s636_s10  ;;  %s63_s15 = sadd.s32 1, %s628_s8 }
   0x6   : > { %p28_p0 = scmp.ge.s32.totalorder %s26_s14, 2  ;;  %p73_p1 = scmp.ne.s32.totalorder %s628_s8, %s624_s7 }
   0x7   : > { %p74_p2 = scmp.eq.s32.totalorder %s457_s12, 1  ;;  %p79_p3 = scmp.ne.s32.totalorder %s624_s7, %s620_s6 }
   0x8   : > { %s872_s14 = smov (%p28_p0, %s26_s14), 0  ;;  %p80_p5 = scmp.eq.s32.totalorder %s458_s13, 1 }
   0x9   : > { %p697_p4 = por %p74_p2, %p73_p1  ;;  %s58_s17 = ssub.s32 %s636_s10, %s872_s14 }
   0xa   : > { %p461_p6 = scmp.ge.s32.totalorder %s640_s11, 1  ;;  %p61_p7 = scmp.eq.s32.totalorder %s58_s17, 0 }
   0xb   : > { %p704_p8 = por %p80_p5, %p79_p3  ;;  %p112_p9 = scmp.lt.s32.totalorder %s640_s11, 3 }
   0xc   : > { %s710_s19 = scalar_select %p61_p7, %s628_s8, %s63_s15  }
   0xd   : > { %p113_p10 = pnand %p461_p6, %p112_p9 }
   0xe   : > { %p138_p11 = scmp.lt.s32.totalorder (!%p113_p10), %s632_s9, 1  ;;  %s642_s25 = smov (!%p113_p10), 4   ;;  %vm308_vm0 = vcmask (!%p113_p10), 31744   ;;  %vm317_vm1 = vcmask (!%p113_p10), 64512   ;;  %vm326_vm2 = vcmask (!%p113_p10), 97280   ;;  %vm335_vm3 = vcmask (!%p113_p10), 130048  }
   0xf   : > { %116 = sbr.rel (%p113_p10) target bundleno = 203 (0xcb), region = 24  ;;  %s643_s26 = smov (!%p113_p10), 8  }
  0x10   : > { %s644_s27 = smov (!%p113_p10), 12   ;;  %s134_s28 = sand.u32 (!%p113_p10), 1, %s624_s7  }
  0x11   : > { %s462_s29 = sshll.u32 (!%p113_p10), %s134_s28, 6  ;;  %s502_s2 = sshll.u32 (!%p113_p10), %s632_s9, 10 }
  0x12   : > { %s764_s30 = scalar_lea.vmem (!%p113_p10), [#allocation2], %s462_s29  ;;  %s815_s12 = scalar_lea.sflag (!%p113_p10), [#allocation3], %s134_s28 }
  0x13   : > { %s360_s3 = sshll.u32 (!%p113_p10), %s764_s30, 4  ;;  %s645_s15 = smov (!%p113_p10), [#allocation2]   ;;  %s805_s3 = int_to_ptr.vmem [resolvable:$true] %s360_s3 }
  0x14   : > { %s562_s13 = scalar_lea.vmem (!%p113_p10), %s805_s3, 1024  ;;  %s566_s17 = sshll.u32 (!%p113_p10), %s645_s15, 4  ;;  %s567_s17 = int_to_ptr.vmem [resolvable:$false] %s566_s17 }
  0x15   : > { %p563_p12 = scmp.ne.s32.totalorder (!%p113_p10), %s805_s3, %s562_s13  ;;  %p569_p1 = scmp.lt.s32.totalorder (!%p113_p10), %s805_s3, %s567_s17 }
  0x16   : > { %s139_s20 = scalar_select %p138_p11, %s632_s9, 1 }
  0x17   : > { %s801_s9 = scalar_lea.hbm %s863_s1, %s502_s2  ;;  %p564_p13 = pnand %p563_p12, %p697_p4 }
  0x18   : > { %s501_s21 = sshll.u32 %s139_s20, 8  ;;  %s568_s20 = scalar_lea.vmem %s567_s17, 2048 }
  0x19   : > { %s717_s24 = scalar_lea.vmem %s862_s0, %s501_s21  ;;  %p565_p0 = pneg %p564_p13 }
  0x1a   : > { %v474_v0 = vld [vmem:[%s717_s24 + $0x41] ss:$2 sm:$0xff]  ;;  %v481_v8 = vld [vmem:[%s717_s24 + $0x30] ss:$2 sm:$0xff]  ;;  %v489_v16 = vld [vmem:[%s717_s24 + $0x31] ss:$2 sm:$0xff]  ;;  %p570_p2 = scmp.lt.s32.totalorder %s568_s20, %s562_s13 }
  0x1b   : > { %v472_v1 = vld [vmem:[%s717_s24 + $0x1] ss:$2 sm:$0xff]  ;;  %224 = vrot.lane.b32.xlu1 %v474_v0, %s642_s25  ;;  %v480_v9 = vld [vmem:[%s717_s24 + $0x10] ss:$2 sm:$0xff]  ;;  %v488_v17 = vld [vmem:[%s717_s24 + $0x11] ss:$2 sm:$0xff] }
  0x1c   : > { %220 = vrot.lane.b32.xlu0 %v472_v1, %s642_s25  ;;  %v475_v2 = vld [vmem:[%s717_s24 + $0x61] ss:$2 sm:$0xff]  ;;  %v483_v10 = vld [vmem:[%s717_s24 + $0x70] ss:$2 sm:$0xff]  ;;  %v491_v18 = vld [vmem:[%s717_s24 + $0x71] ss:$2 sm:$0xff]  ;;  %p571_p3 = por %p570_p2, %p569_p1 }
  0x1d   : > { %v473_v3 = vld [vmem:[%s717_s24 + $0x21] ss:$2 sm:$0xff]  ;;  %v482_v11 = vld [vmem:[%s717_s24 + $0x50] ss:$2 sm:$0xff]  ;;  %v490_v19 = vld [vmem:[%s717_s24 + $0x51] ss:$2 sm:$0xff] }
  0x1e   : > { %v477_v4 = vld [vmem:[%s717_s24 + $0xa1] ss:$2 sm:$0xff]  ;;  %v485_v12 = vld [vmem:[%s717_s24 + $0xb0] ss:$2 sm:$0xff]  ;;  %v493_v20 = vld [vmem:[%s717_s24 + $0xb1] ss:$2 sm:$0xff]  ;;  %p572_p5 = pnand %p571_p3, %p565_p0 }
  0x1f   : > { %226 = vrot.lane.b32.xlu1 %v475_v2, %s642_s25  ;;  %v476_v5 = vld [vmem:[%s717_s24 + $0x81] ss:$2 sm:$0xff]  ;;  %v484_v13 = vld [vmem:[%s717_s24 + $0x90] ss:$2 sm:$0xff]  ;;  %v492_v21 = vld [vmem:[%s717_s24 + $0x91] ss:$2 sm:$0xff] }
  0x20   : > { %222 = vrot.lane.b32.xlu0 %v473_v3, %s642_s25  ;;  %v479_v6 = vld [vmem:[%s717_s24 + $0xe1] ss:$2 sm:$0xff]  ;;  %v487_v14 = vld [vmem:[%s717_s24 + $0xf0] ss:$2 sm:$0xff]  ;;  %v495_v22 = vld [vmem:[%s717_s24 + $0xf1] ss:$2 sm:$0xff] }
  0x21   : > { %v478_v7 = vld [vmem:[%s717_s24 + $0xc1] ss:$2 sm:$0xff]  ;;  %v486_v15 = vld [vmem:[%s717_s24 + $0xd0] ss:$2 sm:$0xff]  ;;  %v494_v23 = vld [vmem:[%s717_s24 + $0xd1] ss:$2 sm:$0xff] }
  0x22   : > { %v149_v38 = vld [vmem:[%s717_s24] ss:$2 sm:$0xff] }
  0x23   : > { %230 = vrot.lane.b32.xlu1 %v477_v4, %s642_s25  ;;  %v465_v39 = vld [vmem:[%s717_s24 + $0x20] ss:$2 sm:$0xff] }
  0x24   : > { %228 = vrot.lane.b32.xlu0 %v476_v5, %s642_s25  ;;  %v466_v44 = vld [vmem:[%s717_s24 + $0x40] ss:$2 sm:$0xff] }
  0x25   : > { %v467_v45 = vld [vmem:[%s717_s24 + $0x60] ss:$2 sm:$0xff] }
  0x26   : > { %v469_v54 = vld [vmem:[%s717_s24 + $0xa0] ss:$2 sm:$0xff] }
  0x27   : > { %234 = vrot.lane.b32.xlu1 %v479_v6, %s642_s25  ;;  %v468_v55 = vld [vmem:[%s717_s24 + $0x80] ss:$2 sm:$0xff] }
  0x28   : > { %232 = vrot.lane.b32.xlu0 %v478_v7, %s642_s25  ;;  %v471_v0 = vld [vmem:[%s717_s24 + $0xe0] ss:$2 sm:$0xff] }
  0x29   : > { %v470_v1 = vld [vmem:[%s717_s24 + $0xc0] ss:$2 sm:$0xff] }
  0x2b   : > { %254 = vrot.lane.b32.xlu1 %v481_v8, %s643_s26 }
  0x2c   : > { %252 = vrot.lane.b32.xlu0 %v480_v9, %s643_s26 }
  0x2f   : > { %258 = vrot.lane.b32.xlu1 %v483_v10, %s643_s26 }
  0x30   : > { %256 = vrot.lane.b32.xlu0 %v482_v11, %s643_s26 }
  0x33   : > { %262 = vrot.lane.b32.xlu1 %v485_v12, %s643_s26 }
  0x34   : > { %260 = vrot.lane.b32.xlu0 %v484_v13, %s643_s26 }
  0x37   : > { %266 = vrot.lane.b32.xlu1 %v487_v14, %s643_s26 }
  0x38   : > { %264 = vrot.lane.b32.xlu0 %v486_v15, %s643_s26 }
  0x3b   : > { %286 = vrot.lane.b32.xlu1 %v489_v16, %s644_s27 }
  0x3c   : > { %284 = vrot.lane.b32.xlu0 %v488_v17, %s644_s27 }
  0x3f   : > { %290 = vrot.lane.b32.xlu1 %v491_v18, %s644_s27 }
  0x40   : > { %288 = vrot.lane.b32.xlu0 %v490_v19, %s644_s27 }
  0x43   : > { %294 = vrot.lane.b32.xlu1 %v493_v20, %s644_s27 }
  0x44   : > { %292 = vrot.lane.b32.xlu0 %v492_v21, %s644_s27 }
  0x47   : > { %298 = vrot.lane.b32.xlu1 %v495_v22, %s644_s27 }
  0x48   : > { %296 = vrot.lane.b32.xlu0 %v494_v23, %s644_s27 }
  0x8d   : > { %v225_v24 = vpop.permute.xlu1 %224 }
  0x8e   : > { %v221_v25 = vpop.permute.xlu0 %220  ;;  %v311_v52 = vsel %vm308_vm0, %v466_v44, %v225_v24 }
  0x8f   : > { %v309_v42 = vsel %vm308_vm0, %v149_v38, %v221_v25 }
  0x91   : > { %v227_v26 = vpop.permute.xlu1 %226 }
  0x92   : > { %v223_v27 = vpop.permute.xlu0 %222  ;;  %v312_v53 = vsel %vm308_vm0, %v467_v45, %v227_v26 }
  0x93   : > { %v310_v43 = vsel %vm308_vm0, %v465_v39, %v223_v27 }
  0x95   : > { %v231_v28 = vpop.permute.xlu1 %230 }
  0x96   : > { %v229_v29 = vpop.permute.xlu0 %228  ;;  %v314_v62 = vsel %vm308_vm0, %v469_v54, %v231_v28 }
  0x97   : > { %v313_v63 = vsel %vm308_vm0, %v468_v55, %v229_v29 }
  0x99   : > { %v235_v30 = vpop.permute.xlu1 %234 }
  0x9a   : > { %v233_v31 = vpop.permute.xlu0 %232  ;;  %v316_v8 = vsel %vm308_vm0, %v471_v0, %v235_v30 }
  0x9b   : > { %v315_v9 = vsel %vm308_vm0, %v470_v1, %v233_v31 }
  0x9d   : > { %v255_v32 = vpop.permute.xlu1 %254 }
  0x9e   : > { %v253_v33 = vpop.permute.xlu0 %252  ;;  %v319_v46 = vsel %vm317_vm1, %v310_v43, %v255_v32 }
  0x9f   : > { %v318_v47 = vsel %vm317_vm1, %v309_v42, %v253_v33 }
  0xa1   : > { %v259_v34 = vpop.permute.xlu1 %258 }
  0xa2   : > { %v257_v35 = vpop.permute.xlu0 %256  ;;  %v321_v56 = vsel %vm317_vm1, %v312_v53, %v259_v34 }
  0xa3   : > { %v320_v57 = vsel %vm317_vm1, %v311_v52, %v257_v35 }
  0xa5   : > { %v263_v36 = vpop.permute.xlu1 %262 }
  0xa6   : > { %v261_v37 = vpop.permute.xlu0 %260  ;;  %v323_v2 = vsel %vm317_vm1, %v314_v62, %v263_v36 }
  0xa7   : > { %v322_v3 = vsel %vm317_vm1, %v313_v63, %v261_v37 }
  0xa9   : > { %v267_v40 = vpop.permute.xlu1 %266 }
  0xaa   : > { %v265_v41 = vpop.permute.xlu0 %264  ;;  %v325_v10 = vsel %vm317_vm1, %v316_v8, %v267_v40 }
  0xab   : > { %v324_v11 = vsel %vm317_vm1, %v315_v9, %v265_v41 }
  0xad   : > { %v287_v48 = vpop.permute.xlu1 %286 }
  0xae   : > { %v285_v49 = vpop.permute.xlu0 %284  ;;  %v328_v50 = vsel %vm326_vm2, %v319_v46, %v287_v48 }
  0xaf   : > { %v327_v51 = vsel %vm326_vm2, %v318_v47, %v285_v49  ;;  %337 = vst.msk [vmem:[%s764_s30 + $0x8] sm:$0xff] %vm335_vm3, %v328_v50 }
  0xb0   : > { %336 = vst.msk [vmem:[%s764_s30] sm:$0xff] %vm335_vm3, %v327_v51 }
  0xb1   : > { %v291_v58 = vpop.permute.xlu1 %290 }
  0xb2   : > { %v289_v59 = vpop.permute.xlu0 %288  ;;  %v330_v60 = vsel %vm326_vm2, %v321_v56, %v291_v58 }
  0xb3   : > { %v329_v61 = vsel %vm326_vm2, %v320_v57, %v289_v59  ;;  %339 = vst.msk [vmem:[%s764_s30 + $0x18] sm:$0xff] %vm335_vm3, %v330_v60 }
  0xb4   : > { %338 = vst.msk [vmem:[%s764_s30 + $0x10] sm:$0xff] %vm335_vm3, %v329_v61 }
  0xb5   : > { %v295_v4 = vpop.permute.xlu1 %294 }
  0xb6   : > { %v293_v5 = vpop.permute.xlu0 %292  ;;  %v332_v6 = vsel %vm326_vm2, %v323_v2, %v295_v4 }
  0xb7   : > { %v331_v7 = vsel %vm326_vm2, %v322_v3, %v293_v5  ;;  %341 = vst.msk [vmem:[%s764_s30 + $0x28] sm:$0xff] %vm335_vm3, %v332_v6 }
  0xb8   : > { %340 = vst.msk [vmem:[%s764_s30 + $0x20] sm:$0xff] %vm335_vm3, %v331_v7 }
  0xb9   : > { %v299_v12 = vpop.permute.xlu1 %298 }
  0xba   : > { %v297_v13 = vpop.permute.xlu0 %296  ;;  %v334_v14 = vsel %vm326_vm2, %v325_v10, %v299_v12 }
  0xbb   : > { %v333_v15 = vsel %vm326_vm2, %v324_v11, %v297_v13  ;;  %343 = vst.msk [vmem:[%s764_s30 + $0x38] sm:$0xff] %vm335_vm3, %v334_v14 }
  0xbc   : > { %342 = vst.msk [vmem:[%s764_s30 + $0x30] sm:$0xff] %vm335_vm3, %v333_v15 }
  0xbd   : > { %575 = shalt.err (!%p572_p5)
}
  0xbe   : > { %s576_s21 = scalar_lea.hbm %s801_s9, 1024  ;;  %s580_s24 = scalar_lea.hbm %s863_s1, 2048 }
  0xbf   : > { %p577_p6 = scmp.ne.s32.totalorder %s801_s9, %s576_s21  ;;  %p581_p10 = scmp.lt.u32.totalorder %s801_s9, %s863_s1 }
  0xc0   : > { %p582_p11 = scmp.lt.u32.totalorder %s580_s24, %s576_s21  ;;  %p584_p13 = scmp.lt.u32.totalorder %s576_s21, %s801_s9 }
  0xc1   : > { %p578_p7 = pnand %p577_p6, %p697_p4 }
  0xc2   : > { %p583_p12 = por %p582_p11, %p581_p10 }
  0xc3   : > { %p579_p9 = pneg %p578_p7 }
  0xc4   : > { %p585_p0 = por %p584_p13, %p583_p12 }
  0xc6   : > { %p586_p1 = pnand %p585_p0, %p579_p9 }
  0xc8   : > { %589 = shalt.err (!%p586_p1)
}
  0xc9   : > { %s646_s28 = smov 128  }
  0xca   : > { %503 = dma.vmem_to_hbm [thread:$0]  (%p697_p4), %s805_s3, 1024, %s801_s9, %s815_s12, %s646_s28, %s646_s28, %s643_s26  }
  0xcb PF: > { %p509_p2 = scmp.ge.s32.totalorder %s640_s11, 2  ;;  %s375_s29 = sand.u32 1, %s620_s6  }
  0xcc   : > { %s376_s30 = scalar_lea.sflag [#allocation3], %s375_s29 }
  0xcd   : > { %p506_p3 = pnand %p509_p2, %p704_p8 }
  0xcf   : > { %615 = dma.done.wait (!%p506_p3), %s376_s30, 1024  }
  0xd0   : > { %617 = vsyncadd (!%p506_p3), %s376_s30, 4294966272  ;;  %s14_s11 = sadd.s32 1, %s640_s11   ;;  %s866_s6 = smov %s624_s7 }
  0xd1   : > { %p11_p5 = scmp.ge.s32.totalorder %s14_s11, 4   ;;  %s867_s7 = smov %s628_s8 }
  0xd2   : > { %s868_s8 = smov %s710_s19  ;;  %s869_s9 = smov %s636_s10 }
  0xd3   : > { %s870_s10 = smov %s872_s14  ;;  %13 = sbr.rel (!%p11_p5) target bundleno = 4 (0x4), region = 90 }
  0xda   :  { %381 = vsyncpa [#allocation3], 1 }
  0xdb   :  { %383 = vsyncpa [#allocation3 + $0x1], 1 }

</bundles_post_ra>
